<compile_context>
chip_gen: v5e
topology: v5e:2x2
jax: 0.10.0
libtpu: 0.0.40
codegen_flags: <defaults>
</compile_context>

<pallas_src>
import functools

import jax
import jax.numpy as jnp
from jax import lax
from jax.experimental import pallas as pl
from jax.experimental.pallas import tpu as pltpu

ENCODER_HIDDEN = 32
DECODER_HIDDEN = 32


# --------------------------- shared masked softmax + context ---------------------------
def _masked_softmax_context(scores, s_b, length, s_iota):
    """scores (S,L), s_b (S,E), length scalar int32, s_iota (S,1) int32 -> context (L,E).

    Reference masked_softmax: exp(s)*m / sum(exp(s)*m).  Subtracting the per-column max
    cancels out and is numerically safer."""
    mask = (s_iota < length).astype(jnp.float32)                     # (S, 1)
    m = jnp.max(scores, axis=0, keepdims=True)                       # (1, L)  XLU sublane max
    p = jnp.exp(scores - m) * mask                                   # (S, L)  EUP exp
    denom = jnp.sum(p, axis=0, keepdims=True)                        # (1, L)
    alpha = p * pl.reciprocal(denom, approx=True)                    # (S, L)  EUP divide
    # context[l, e] = sum_s alpha[s, l] * src[s, e]   (contract dim 0 of both on the MXU)
    return lax.dot_general(alpha, s_b, (((0,), (0,)), ((), ())),
                           preferred_element_type=jnp.float32)       # (L, E)


# --------------------------------- 'General' attention ---------------------------------
def _general_attention_kernel(ht_ref, src_ref, wa_t_ref, len_ref, ctx_ref):
    """ht_ref  (L*B, Dd)  h_t, time-major rows l*B+b (free reshape of (L,B,Dd))
       src_ref (S*B, De)  src_encodings rows s*B+b
       wa_t_ref (De, Dd)  Wa.weight.T            (nn.Linear(De, Dd, bias=False))
       len_ref (B,) int32 src_lengths            (SMEM)
       ctx_ref (L, B*De)  lane-dense context output."""
    B = len_ref.shape[0]
    L = ht_ref.shape[0] // B
    S = src_ref.shape[0] // B
    wa_t = wa_t_ref[...]                                             # resident weights
    s_iota = lax.broadcasted_iota(jnp.int32, (S, 1), 0)              # hoisted once

    ctx_cols = []
    for b in range(B):  # B is tiny & static -> fully unrolled, no grid-step overhead
        h_b = ht_ref[pl.ds(b, L, stride=B), :]                       # (L, Dd) strided rows
        s_b = src_ref[pl.ds(b, S, stride=B), :]                      # (S, De)
        wh_b = jnp.dot(s_b, wa_t, preferred_element_type=jnp.float32)          # (S, Dd)
        scores = lax.dot_general(wh_b, h_b, (((1,), (1,)), ((), ())),
                                 preferred_element_type=jnp.float32)           # (S, L)
        ctx_cols.append(_masked_softmax_context(scores, s_b, len_ref[b], s_iota))
    ctx_ref[...] = jnp.concatenate(ctx_cols, axis=-1)                # (L, B*De): one vst


def global_attention_general(params, h_t, src_encodings, src_lengths):
    """h_t (L,B,Dd), src_encodings (S,B,De), src_lengths (B,) int32 -> context (L,B,De)."""
    L, B, Dd = h_t.shape
    S, _, De = src_encodings.shape
    ctx_flat = pl.pallas_call(
        _general_attention_kernel,
        out_shape=jax.ShapeDtypeStruct((L, B * De), jnp.float32),
        in_specs=[
            pl.BlockSpec(memory_space=pltpu.MemorySpace.VMEM),   # h_t (flattened)
            pl.BlockSpec(memory_space=pltpu.MemorySpace.VMEM),   # src (flattened)
            pl.BlockSpec(memory_space=pltpu.MemorySpace.VMEM),   # Wa^T
            pl.BlockSpec(memory_space=pltpu.MemorySpace.SMEM),   # src_lengths
        ],
        out_specs=pl.BlockSpec(memory_space=pltpu.MemorySpace.VMEM),
    )(h_t.reshape(L * B, Dd), src_encodings.reshape(S * B, De),
      params['wa_t'], src_lengths)
    return ctx_flat.reshape(L, B, De)       # free row-major split of lane-dense output


# ---------------------------------- 'Concat' attention ----------------------------------
def _concat_attention_kernel(ht_ref, src_ref, wa_h_ref, wa_s_ref, va_ref, len_ref, ctx_ref):
    """Wa([h_t; src]) is split along the input dim (wa_h for h_t features, wa_s for src
    features), so no in-kernel lane concat of activations is needed.  va_ref is Va.weight
    (1, Do)."""
    B = len_ref.shape[0]
    L = ht_ref.shape[0] // B
    S = src_ref.shape[0] // B
    wa_h = wa_h_ref[...]                                             # (Dd, Do)
    wa_s = wa_s_ref[...]                                             # (De, Do)
    va = va_ref[...]                                                 # (1, Do)
    s_iota = lax.broadcasted_iota(jnp.int32, (S, 1), 0)

    ctx_cols = []
    for b in range(B):
        h_b = ht_ref[pl.ds(b, L, stride=B), :]                       # (L, Dd)
        s_b = src_ref[pl.ds(b, S, stride=B), :]                      # (S, De)
        th = jnp.dot(h_b, wa_h, preferred_element_type=jnp.float32)  # (L, Do)
        ts = jnp.dot(s_b, wa_s, preferred_element_type=jnp.float32)  # (S, Do)
        t3 = jnp.tanh(ts[:, None, :] + th[None, :, :])               # (S, L, Do)  EUP tanh
        scores = jnp.sum(t3 * va[None, :, :], axis=-1)               # (S, L)  lane reduce
        ctx_cols.append(_masked_softmax_context(scores, s_b, len_ref[b], s_iota))
    ctx_ref[...] = jnp.concatenate(ctx_cols, axis=-1)


def global_attention_concat(params, h_t, src_encodings, src_lengths):
    L, B, Dd = h_t.shape
    S, _, De = src_encodings.shape
    ctx_flat = pl.pallas_call(
        _concat_attention_kernel,
        out_shape=jax.ShapeDtypeStruct((L, B * De), jnp.float32),
        in_specs=[
            pl.BlockSpec(memory_space=pltpu.MemorySpace.VMEM),
            pl.BlockSpec(memory_space=pltpu.MemorySpace.VMEM),
            pl.BlockSpec(memory_space=pltpu.MemorySpace.VMEM),
            pl.BlockSpec(memory_space=pltpu.MemorySpace.VMEM),
            pl.BlockSpec(memory_space=pltpu.MemorySpace.VMEM),
            pl.BlockSpec(memory_space=pltpu.MemorySpace.SMEM),
        ],
        out_specs=pl.BlockSpec(memory_space=pltpu.MemorySpace.VMEM),
    )(h_t.reshape(L * B, Dd), src_encodings.reshape(S * B, De),
      params['wa_h'], params['wa_s'], params['va'], src_lengths)
    return ctx_flat.reshape(L, B, De)


# -------------------------------- parameter preparation --------------------------------
def prepare_general_params(wa_weight):
    """wa_weight: PyTorch nn.Linear(De, Dd, bias=False).weight, shape (Dd, De)."""
    return {'wa_t': jnp.asarray(wa_weight).T}                        # (De, Dd)


def prepare_concat_params(wa_weight, va_weight):
    """wa_weight: nn.Linear(Dd+De, Dd).weight, shape (Dd, Dd+De);
       va_weight: nn.Linear(Dd, 1).weight, shape (1, Dd).
    cat order in forward is [h_t, src], so the first Dd input columns multiply h_t.
    (output_size == decoder_hidden in this module, so Dd == va_weight.shape[1].)"""
    Dd = int(jnp.asarray(va_weight).shape[1])
    wt = jnp.asarray(wa_weight).T                                    # (Dd+De, Do)
    return {'wa_h': wt[:Dd], 'wa_s': wt[Dd:], 'va': jnp.asarray(va_weight)}


# ------------------------------------ JAX references ------------------------------------
def general_attention_ref(h_t, src, lengths, wa_weight):
    S = src.shape[0]
    wahs = jnp.einsum('sbe,de->sbd', src, wa_weight)
    scores = jnp.einsum('sbd,lbd->slb', wahs, h_t)
    mask = (jnp.arange(S)[:, None] < lengths[None, :]).astype(jnp.float32)
    p = jnp.exp(scores) * mask[:, None, :]
    alpha = p / jnp.sum(p, axis=0, keepdims=True)
    return jnp.einsum('slb,sbe->lbe', alpha, src)


def concat_attention_ref(h_t, src, lengths, wa_weight, va_weight):
    S, B, De = src.shape
    L, _, Dd = h_t.shape
    expand_ht = jnp.broadcast_to(h_t[None, :, :, :], (S, L, B, Dd))
    expand_src = jnp.broadcast_to(src[:, None, :, :], (S, L, B, De))
    concat = jnp.concatenate([expand_ht, expand_src], axis=-1)
    pre = jnp.einsum('slbi,oi->slbo', concat, wa_weight)
    scores = jnp.einsum('slbo,po->slbp', jnp.tanh(pre), va_weight)[..., 0]
    mask = (jnp.arange(S)[:, None] < lengths[None, :]).astype(jnp.float32)
    p = jnp.exp(scores) * mask[:, None, :]
    alpha = p / jnp.sum(p, axis=0, keepdims=True)
    return jnp.einsum('slb,sbe->lbe', alpha, src)


if __name__ == "__main__":
    L, B, S = 8, 4, 8
    De, Dd = ENCODER_HIDDEN, DECODER_HIDDEN
    key = jax.random.PRNGKey(0)
    k_h, k_s, k_wg, k_wc, k_v = jax.random.split(key, 5)

    h_t = jax.random.normal(k_h, (L, B, Dd), jnp.float32) * 0.1       # decoder states
    src_encodings = jax.random.normal(k_s, (S, B, De), jnp.float32) * 0.1
    src_lengths = jnp.array([8, 5, 8, 3], dtype=jnp.int32)

    wa_general = jax.random.normal(k_wg, (Dd, De), jnp.float32) * 0.1        # Linear(De, Dd)
    wa_concat = jax.random.normal(k_wc, (Dd, Dd + De), jnp.float32) * 0.1    # Linear(Dd+De, Dd)
    va_weight = jax.random.normal(k_v, (1, Dd), jnp.float32) * 0.1           # Linear(Dd, 1)

    params_g = prepare_general_params(wa_general)
    params_c = prepare_concat_params(wa_concat, va_weight)

    general_fwd = jax.jit(functools.partial(global_attention_general, params_g))
    concat_fwd = jax.jit(functools.partial(global_attention_concat, params_c))

    ctx_g = general_fwd(h_t, src_encodings, src_lengths)
    ctx_c = concat_fwd(h_t, src_encodings, src_lengths)
    jax.block_until_ready((ctx_g, ctx_c))

    assert ctx_g.shape == (L, B, De)
    assert ctx_c.shape == (L, B, De)
    assert bool(jnp.all(jnp.isfinite(ctx_g)))
    assert bool(jnp.all(jnp.isfinite(ctx_c)))

    ref_g = general_attention_ref(h_t, src_encodings, src_lengths, wa_general)
    ref_c = concat_attention_ref(h_t, src_encodings, src_lengths, wa_concat, va_weight)
    # loose tolerance only because pl.reciprocal(approx=True) is used in the softmax
    assert bool(jnp.allclose(ctx_g, ref_g, rtol=2e-2, atol=2e-3))
    assert bool(jnp.allclose(ctx_c, ref_c, rtol=2e-2, atol=2e-3))

    print("KERNEL_OK")
</pallas_src>

<mosaic_0001>
module attributes {stable_mosaic.version = 11 : i64} {
  func.func @_general_attention_kernel(%arg0: memref<32x32xf32, #tpu.memory_space<vmem>>, %arg1: memref<32x32xf32, #tpu.memory_space<vmem>>, %arg2: memref<32x32xf32, #tpu.memory_space<vmem>>, %arg3: memref<4xi32, #tpu.memory_space<smem>>, %arg4: memref<8x128xf32, #tpu.memory_space<vmem>>) attributes {dimension_semantics = [], scalar_prefetch = 0 : i64, scratch_operands = 0 : i64, tpu.core_type = #tpu.core_type<tc>} {
    %c0 = arith.constant 0 : index
    %c0_0 = arith.constant 0 : index
    %0 = vector.load %arg2[%c0, %c0_0] : memref<32x32xf32, #tpu.memory_space<vmem>>, vector<32x32xf32>
    %1 = tpu.iota {dimensions = array<i32: 0>} : vector<8x1xi32>
    %c0_1 = arith.constant 0 : index
    %c0_2 = arith.constant 0 : index
    %2 = tpu.strided_load %arg0[%c0_1, %c0_2] {strides = array<i32: 4, 1>} : memref<32x32xf32, #tpu.memory_space<vmem>>, vector<8x32xf32>
    %c0_3 = arith.constant 0 : index
    %c0_4 = arith.constant 0 : index
    %3 = tpu.strided_load %arg1[%c0_3, %c0_4] {strides = array<i32: 4, 1>} : memref<32x32xf32, #tpu.memory_space<vmem>>, vector<8x32xf32>
    %cst = arith.constant dense<0.000000e+00> : vector<8x32xf32>
    %4 = tpu.matmul %3, %0, %cst {dimension_numbers = #tpu.dot_dimension_numbers<[1], [0], [0], [1], [0, 0, 1, 1], [], []>} : vector<8x32xf32>, vector<32x32xf32>, vector<8x32xf32> -> vector<8x32xf32>
    %cst_5 = arith.constant dense<0.000000e+00> : vector<8x8xf32>
    %5 = tpu.matmul %4, %2, %cst_5 {dimension_numbers = #tpu.dot_dimension_numbers<[1], [1], [0], [0], [0, 0, 1, 0], [], []>} : vector<8x32xf32>, vector<8x32xf32>, vector<8x8xf32> -> vector<8x8xf32>
    %c0_6 = arith.constant 0 : index
    %6 = memref.load %arg3[%c0_6] : memref<4xi32, #tpu.memory_space<smem>>
    %7 = vector.broadcast %6 : i32 to vector<8x1xi32>
    %8 = arith.cmpi slt, %1, %7 : vector<8x1xi32>
    %9 = arith.extui %8 : vector<8x1xi1> to vector<8x1xi32>
    %10 = arith.sitofp %9 : vector<8x1xi32> to vector<8x1xf32>
    %cst_7 = arith.constant dense<0xFF800000> : vector<8xf32>
    %11 = vector.multi_reduction <maximumf>, %5, %cst_7 [0] : vector<8x8xf32> to vector<8xf32>
    %12 = vector.shape_cast %11 : vector<8xf32> to vector<1x8xf32>
    %13 = vector.broadcast %12 : vector<1x8xf32> to vector<8x8xf32>
    %14 = arith.subf %5, %13 : vector<8x8xf32>
    %15 = math.exp %14 : vector<8x8xf32>
    %16 = vector.broadcast %10 : vector<8x1xf32> to vector<8x8xf32>
    %17 = arith.mulf %15, %16 : vector<8x8xf32>
    %cst_8 = arith.constant dense<0.000000e+00> : vector<8xf32>
    %18 = vector.multi_reduction <add>, %17, %cst_8 [0] : vector<8x8xf32> to vector<8xf32>
    %19 = vector.shape_cast %18 : vector<8xf32> to vector<1x8xf32>
    %20 = tpu.reciprocal %19 {approx = true} : vector<1x8xf32> -> vector<1x8xf32>
    %21 = vector.broadcast %20 : vector<1x8xf32> to vector<8x8xf32>
    %22 = arith.mulf %17, %21 : vector<8x8xf32>
    %cst_9 = arith.constant dense<0.000000e+00> : vector<8x32xf32>
    %23 = tpu.matmul %22, %3, %cst_9 {dimension_numbers = #tpu.dot_dimension_numbers<[0], [0], [1], [1], [0, 1, 1, 1], [], []>} : vector<8x8xf32>, vector<8x32xf32>, vector<8x32xf32> -> vector<8x32xf32>
    %c1 = arith.constant 1 : index
    %c0_10 = arith.constant 0 : index
    %24 = tpu.strided_load %arg0[%c1, %c0_10] {strides = array<i32: 4, 1>} : memref<32x32xf32, #tpu.memory_space<vmem>>, vector<8x32xf32>
    %c1_11 = arith.constant 1 : index
    %c0_12 = arith.constant 0 : index
    %25 = tpu.strided_load %arg1[%c1_11, %c0_12] {strides = array<i32: 4, 1>} : memref<32x32xf32, #tpu.memory_space<vmem>>, vector<8x32xf32>
    %cst_13 = arith.constant dense<0.000000e+00> : vector<8x32xf32>
    %26 = tpu.matmul %25, %0, %cst_13 {dimension_numbers = #tpu.dot_dimension_numbers<[1], [0], [0], [1], [0, 0, 1, 1], [], []>} : vector<8x32xf32>, vector<32x32xf32>, vector<8x32xf32> -> vector<8x32xf32>
    %cst_14 = arith.constant dense<0.000000e+00> : vector<8x8xf32>
    %27 = tpu.matmul %26, %24, %cst_14 {dimension_numbers = #tpu.dot_dimension_numbers<[1], [1], [0], [0], [0, 0, 1, 0], [], []>} : vector<8x32xf32>, vector<8x32xf32>, vector<8x8xf32> -> vector<8x8xf32>
    %c1_15 = arith.constant 1 : index
    %28 = memref.load %arg3[%c1_15] : memref<4xi32, #tpu.memory_space<smem>>
    %29 = vector.broadcast %28 : i32 to vector<8x1xi32>
    %30 = arith.cmpi slt, %1, %29 : vector<8x1xi32>
    %31 = arith.extui %30 : vector<8x1xi1> to vector<8x1xi32>
    %32 = arith.sitofp %31 : vector<8x1xi32> to vector<8x1xf32>
    %cst_16 = arith.constant dense<0xFF800000> : vector<8xf32>
    %33 = vector.multi_reduction <maximumf>, %27, %cst_16 [0] : vector<8x8xf32> to vector<8xf32>
    %34 = vector.shape_cast %33 : vector<8xf32> to vector<1x8xf32>
    %35 = vector.broadcast %34 : vector<1x8xf32> to vector<8x8xf32>
    %36 = arith.subf %27, %35 : vector<8x8xf32>
    %37 = math.exp %36 : vector<8x8xf32>
    %38 = vector.broadcast %32 : vector<8x1xf32> to vector<8x8xf32>
    %39 = arith.mulf %37, %38 : vector<8x8xf32>
    %cst_17 = arith.constant dense<0.000000e+00> : vector<8xf32>
    %40 = vector.multi_reduction <add>, %39, %cst_17 [0] : vector<8x8xf32> to vector<8xf32>
    %41 = vector.shape_cast %40 : vector<8xf32> to vector<1x8xf32>
    %42 = tpu.reciprocal %41 {approx = true} : vector<1x8xf32> -> vector<1x8xf32>
    %43 = vector.broadcast %42 : vector<1x8xf32> to vector<8x8xf32>
    %44 = arith.mulf %39, %43 : vector<8x8xf32>
    %cst_18 = arith.constant dense<0.000000e+00> : vector<8x32xf32>
    %45 = tpu.matmul %44, %25, %cst_18 {dimension_numbers = #tpu.dot_dimension_numbers<[0], [0], [1], [1], [0, 1, 1, 1], [], []>} : vector<8x8xf32>, vector<8x32xf32>, vector<8x32xf32> -> vector<8x32xf32>
    %c2 = arith.constant 2 : index
    %c0_19 = arith.constant 0 : index
    %46 = tpu.strided_load %arg0[%c2, %c0_19] {strides = array<i32: 4, 1>} : memref<32x32xf32, #tpu.memory_space<vmem>>, vector<8x32xf32>
    %c2_20 = arith.constant 2 : index
    %c0_21 = arith.constant 0 : index
    %47 = tpu.strided_load %arg1[%c2_20, %c0_21] {strides = array<i32: 4, 1>} : memref<32x32xf32, #tpu.memory_space<vmem>>, vector<8x32xf32>
    %cst_22 = arith.constant dense<0.000000e+00> : vector<8x32xf32>
    %48 = tpu.matmul %47, %0, %cst_22 {dimension_numbers = #tpu.dot_dimension_numbers<[1], [0], [0], [1], [0, 0, 1, 1], [], []>} : vector<8x32xf32>, vector<32x32xf32>, vector<8x32xf32> -> vector<8x32xf32>
    %cst_23 = arith.constant dense<0.000000e+00> : vector<8x8xf32>
    %49 = tpu.matmul %48, %46, %cst_23 {dimension_numbers = #tpu.dot_dimension_numbers<[1], [1], [0], [0], [0, 0, 1, 0], [], []>} : vector<8x32xf32>, vector<8x32xf32>, vector<8x8xf32> -> vector<8x8xf32>
    %c2_24 = arith.constant 2 : index
    %50 = memref.load %arg3[%c2_24] : memref<4xi32, #tpu.memory_space<smem>>
    %51 = vector.broadcast %50 : i32 to vector<8x1xi32>
    %52 = arith.cmpi slt, %1, %51 : vector<8x1xi32>
    %53 = arith.extui %52 : vector<8x1xi1> to vector<8x1xi32>
    %54 = arith.sitofp %53 : vector<8x1xi32> to vector<8x1xf32>
    %cst_25 = arith.constant dense<0xFF800000> : vector<8xf32>
    %55 = vector.multi_reduction <maximumf>, %49, %cst_25 [0] : vector<8x8xf32> to vector<8xf32>
    %56 = vector.shape_cast %55 : vector<8xf32> to vector<1x8xf32>
    %57 = vector.broadcast %56 : vector<1x8xf32> to vector<8x8xf32>
    %58 = arith.subf %49, %57 : vector<8x8xf32>
    %59 = math.exp %58 : vector<8x8xf32>
    %60 = vector.broadcast %54 : vector<8x1xf32> to vector<8x8xf32>
    %61 = arith.mulf %59, %60 : vector<8x8xf32>
    %cst_26 = arith.constant dense<0.000000e+00> : vector<8xf32>
    %62 = vector.multi_reduction <add>, %61, %cst_26 [0] : vector<8x8xf32> to vector<8xf32>
    %63 = vector.shape_cast %62 : vector<8xf32> to vector<1x8xf32>
    %64 = tpu.reciprocal %63 {approx = true} : vector<1x8xf32> -> vector<1x8xf32>
    %65 = vector.broadcast %64 : vector<1x8xf32> to vector<8x8xf32>
    %66 = arith.mulf %61, %65 : vector<8x8xf32>
    %cst_27 = arith.constant dense<0.000000e+00> : vector<8x32xf32>
    %67 = tpu.matmul %66, %47, %cst_27 {dimension_numbers = #tpu.dot_dimension_numbers<[0], [0], [1], [1], [0, 1, 1, 1], [], []>} : vector<8x8xf32>, vector<8x32xf32>, vector<8x32xf32> -> vector<8x32xf32>
    %c3 = arith.constant 3 : index
    %c0_28 = arith.constant 0 : index
    %68 = tpu.strided_load %arg0[%c3, %c0_28] {strides = array<i32: 4, 1>} : memref<32x32xf32, #tpu.memory_space<vmem>>, vector<8x32xf32>
    %c3_29 = arith.constant 3 : index
    %c0_30 = arith.constant 0 : index
    %69 = tpu.strided_load %arg1[%c3_29, %c0_30] {strides = array<i32: 4, 1>} : memref<32x32xf32, #tpu.memory_space<vmem>>, vector<8x32xf32>
    %cst_31 = arith.constant dense<0.000000e+00> : vector<8x32xf32>
    %70 = tpu.matmul %69, %0, %cst_31 {dimension_numbers = #tpu.dot_dimension_numbers<[1], [0], [0], [1], [0, 0, 1, 1], [], []>} : vector<8x32xf32>, vector<32x32xf32>, vector<8x32xf32> -> vector<8x32xf32>
    %cst_32 = arith.constant dense<0.000000e+00> : vector<8x8xf32>
    %71 = tpu.matmul %70, %68, %cst_32 {dimension_numbers = #tpu.dot_dimension_numbers<[1], [1], [0], [0], [0, 0, 1, 0], [], []>} : vector<8x32xf32>, vector<8x32xf32>, vector<8x8xf32> -> vector<8x8xf32>
    %c3_33 = arith.constant 3 : index
    %72 = memref.load %arg3[%c3_33] : memref<4xi32, #tpu.memory_space<smem>>
    %73 = vector.broadcast %72 : i32 to vector<8x1xi32>
    %74 = arith.cmpi slt, %1, %73 : vector<8x1xi32>
    %75 = arith.extui %74 : vector<8x1xi1> to vector<8x1xi32>
    %76 = arith.sitofp %75 : vector<8x1xi32> to vector<8x1xf32>
    %cst_34 = arith.constant dense<0xFF800000> : vector<8xf32>
    %77 = vector.multi_reduction <maximumf>, %71, %cst_34 [0] : vector<8x8xf32> to vector<8xf32>
    %78 = vector.shape_cast %77 : vector<8xf32> to vector<1x8xf32>
    %79 = vector.broadcast %78 : vector<1x8xf32> to vector<8x8xf32>
    %80 = arith.subf %71, %79 : vector<8x8xf32>
    %81 = math.exp %80 : vector<8x8xf32>
    %82 = vector.broadcast %76 : vector<8x1xf32> to vector<8x8xf32>
    %83 = arith.mulf %81, %82 : vector<8x8xf32>
    %cst_35 = arith.constant dense<0.000000e+00> : vector<8xf32>
    %84 = vector.multi_reduction <add>, %83, %cst_35 [0] : vector<8x8xf32> to vector<8xf32>
    %85 = vector.shape_cast %84 : vector<8xf32> to vector<1x8xf32>
    %86 = tpu.reciprocal %85 {approx = true} : vector<1x8xf32> -> vector<1x8xf32>
    %87 = vector.broadcast %86 : vector<1x8xf32> to vector<8x8xf32>
    %88 = arith.mulf %83, %87 : vector<8x8xf32>
    %cst_36 = arith.constant dense<0.000000e+00> : vector<8x32xf32>
    %89 = tpu.matmul %88, %69, %cst_36 {dimension_numbers = #tpu.dot_dimension_numbers<[0], [0], [1], [1], [0, 1, 1, 1], [], []>} : vector<8x8xf32>, vector<8x32xf32>, vector<8x32xf32> -> vector<8x32xf32>
    %90 = tpu.concatenate %23, %45, %67, %89 in 1 : vector<8x32xf32>, vector<8x32xf32>, vector<8x32xf32>, vector<8x32xf32> -> vector<8x128xf32>
    %c0_37 = arith.constant 0 : index
    %c0_38 = arith.constant 0 : index
    %91 = vector.load %arg4[%c0_37, %c0_38] : memref<8x128xf32, #tpu.memory_space<vmem>>, vector<8x128xf32>
    tpu.vector_store %arg4[%c0_37, %c0_38], %90 {strides = array<i32>} : memref<8x128xf32, #tpu.memory_space<vmem>>, vector<8x128xf32>,
    return
  }
}

</mosaic_0001>

<bundles_post_ra>
// kernel: global_attention_general.1
= control target key start
LH: loop header
LB: loop body
LE: loop exit
PB: predicated region body
PF: predicated region fallthrough
CT: control target
= control target key end

     0   :  { %9 = vsyncpa [#allocation3], 0  ;;  %s867_s0 = inlined_call_operand.hbm [shape: f32[32,32], index: 0, kind: input, shape index: {}]   ;;  %s868_s1 = inlined_call_operand.hbm [shape: f32[32,32], index: 1, kind: input, shape index: {}]   ;;  %s869_s2 = inlined_call_operand.hbm [shape: f32[32,32], index: 2, kind: input, shape index: {}]   ;;  %s870_s3 = inlined_call_operand.vmem [shape: s32[4], index: 3, kind: input, shape index: {}]   ;;  %s871_s4 = inlined_call_operand.vmem [shape: f32[8,128], index: 4, kind: output, shape index: {}]  }
   0x1   :  { %10 = vsyncpa [#allocation6], 0 }
   0x2   :  { %11 = vsyncpa [#allocation4], 0  ;;  %s29_s17 = sshll.u32 %s868_s1, 4  ;;  %s779_s18 = smov [#allocation5]   ;;  %s30_s17 = int_to_ptr.hbm [resolvable:$true] %s29_s17 }
   0x3   :  { %s31_s19 = sshll.u32 %s779_s18, 4  ;;  %s16_s22 = sshll.u32 %s867_s0, 4  ;;  %s32_s19 = int_to_ptr.vmem [resolvable:$true] %s31_s19  ;;  %s17_s22 = int_to_ptr.hbm [resolvable:$true] %s16_s22 }
   0x4   :  { %s780_s23 = smov 128   ;;  %s781_s24 = smov 8  }
   0x5   :  { %37 = dma.hbm_to_vmem [thread:$0]  %s30_s17, 512, %s32_s19, [#allocation6], %s780_s23, %s780_s23, %s781_s24  }
   0x6   :  { %s782_s25 = smov [#allocation2]   ;;  %s42_s29 = sshll.u32 %s869_s2, 4  ;;  %s43_s29 = int_to_ptr.hbm [resolvable:$true] %s42_s29 }
   0x7   :  { %s18_s26 = sshll.u32 %s782_s25, 4  ;;  %s56_s5 = sshll.u32 %s870_s3, 4  ;;  %s19_s26 = int_to_ptr.vmem [resolvable:$true] %s18_s26  ;;  %s57_s5 = int_to_ptr.vmem [resolvable:$true] %s56_s5 }
   0x8   :  { %24 = dma.hbm_to_vmem [thread:$0]  %s17_s22, 512, %s19_s26, [#allocation3], %s780_s23, %s780_s23, %s781_s24  }
   0x9   :  { %s783_s6 = smov [#allocation7]   ;;  %s784_s0 = smov [#allocation8]  }
   0xa   :  { %s44_s7 = sshll.u32 %s783_s6, 4  ;;  %s45_s7 = int_to_ptr.vmem [resolvable:$true] %s44_s7 }
   0xb   :  { %50 = dma.hbm_to_vmem [thread:$0]  %s43_s29, 512, %s45_s7, [#allocation6], %s780_s23, %s780_s23, %s781_s24  }
   0xc   :  { %59 = dma.vmem_to_smem %s57_s5, 16, %s784_s0, [#allocation4]  }
   0xd   :  { %773 = dma.done.wait [#allocation3], 512  }
   0xe   :  { %774 = vsyncadd [#allocation3], 4294966784 }
   0xf   :  { %775 = dma.done.wait [#allocation6], 1024  }
  0x10   :  { %776 = vsyncadd [#allocation6], 4294966272 }
  0x11   :  { %777 = dma.done.wait [#allocation4], 16  }
  0x12   :  { %778 = vsyncadd [#allocation4], 4294967280 }
  0x13   :  { %76 = sfence }
  0x14   :  { %v80_v0 = vld [vmem:[#allocation7 + $0x18] sm:$0xff]  ;;  %v79_v1 = vld [vmem:[#allocation7 + $0x10] sm:$0xff]  ;;  %vm85_vm0 = vcmask 261120   ;;  %v78_v4 = vld [vmem:[#allocation7 + $0x8] sm:$0xff]  ;;  %vm140_vm1 = vcmask 64512   ;;  %s135_s2 = sld [smem:[#allocation8]]  ;;  %v81_v14 = vlaneseq }
  0x15   :  { %101 = vmatpush.msra.mxu0 %v80_v0  ;;  %v84_v2 = vld [vmem:[#allocation5] ss:$4 sm:$0xff]  ;;  %235 = vmatpush.msra.mxu3 %v80_v0  ;;  %v219_v20 = vld [vmem:[#allocation5 + $0x1] ss:$4 sm:$0xff]  ;;  %v352_v21 = vld [vmem:[#allocation5 + $0x2] ss:$4 sm:$0xff] }
  0x16   :  { %v83_v3 = vld [vmem:[#allocation2] ss:$4 sm:$0xff]  ;;  %211 = vmatpush.msra.mxu2 %v84_v2  ;;  %v830_v17 = vshrl.u32 %v81_v14, 7  ;;  %v785_v22 = vmov 0.0   ;;  %v217_v35 = vld [vmem:[#allocation2 + $0x1] ss:$4 sm:$0xff] }
  0x17   :  { %641 = vmatpush.xpose.msk.msra.mxu1 %vm85_vm0, %v83_v3  ;;  %102 = vmatpush.msra.mxu0 %v79_v1  ;;  %v77_v5 = vld [vmem:[#allocation7] sm:$0xff]  ;;  %s654_s3 = sld [smem:[#allocation8 + $0x2]]  ;;  %s786_s9 = smov 32   ;;  %vm628_vm6 = vcmask 523264   ;;  %vm630_vm7 = vcmask 785408  }
  0x18   :  { %236 = vmatpush.msra.mxu3 %v79_v1  ;;  %v350_v36 = vld [vmem:[#allocation2 + $0x2] ss:$4 sm:$0xff]  ;;  %646 = vmatpush.xpose.msk.msrb.mxu2 %vm85_vm0, %v217_v35  ;;  %s648_s8 = sld [smem:[#allocation8 + $0x1]]  ;;  %s787_s10 = smov 64  }
  0x19   :  { %103 = vmatpush.msra.mxu0 %v78_v4  ;;  %s660_s11 = sld [smem:[#allocation8 + $0x3]]  ;;  %s788_s12 = smov 96  }
  0x1a   :  { %237 = vmatpush.msra.mxu3 %v78_v4  ;;  %v136_v19 = vstv %s135_s2 }
  0x1b   :  { %104 = vmatpush.msra.mxu0 %v77_v5  ;;  %vm137_vm2 = vcmp.lt.s32.totalorder %v830_v17, %v136_v19  ;;  %344 = vmatpush.msrb.mxu1 %v219_v20 }
  0x1c   :  { %238 = vmatpush.msra.mxu3 %v77_v5  ;;  %640 = vmatmul.msk.f32.vlgmr.msra.gmra.mxu0 %vm85_vm0, %v84_v2  ;;  %v643_v23 = vsel %vm137_vm2, 1.0, %v785_v22 }
  0x1d   :  { %368 = vmatpush.msrb.mxu0 %v80_v0  ;;  %645 = vmatmul.msk.f32.vlgmr.msra.gmra.mxu3 %vm85_vm0, %v219_v20  ;;  %v403_v51 = vstv %s654_s3 }
  0x1e   :  { %652 = vmatpush.xpose.msk.msrb.mxu3 %vm85_vm0, %v350_v36  ;;  %vm404_vm3 = vcmp.lt.s32.totalorder %v830_v17, %v403_v51 }
  0x1f   :  { %369 = vmatpush.msrb.mxu0 %v79_v1  ;;  %v655_v53 = vsel %vm404_vm3, 1.0, %v785_v22 }
  0x21   :  { %370 = vmatpush.msrb.mxu0 %v78_v4 }
  0x23   :  { %371 = vmatpush.msrb.mxu0 %v77_v5 }
  0x24   :  { %651 = vmatmul.msk.f32.vlgmr.msrb.gmra.mxu0 %vm85_vm0, %v352_v21 }
  0x99   :  { %v106_v6 = vpop.f32.mrf.mxu0 }
  0x9a   :  { %642 = vmatmul.msk.f32.vlgmr.msra.gmra.mxu1 %vm85_vm0, %v106_v6 }
  0x9b   :  { %501 = vmatpush.msra.mxu1 %v80_v0 }
  0x9d   :  { %502 = vmatpush.msra.mxu1 %v79_v1 }
  0x9f   :  { %503 = vmatpush.msra.mxu1 %v78_v4 }
  0xa0   :  { %v240_v39 = vpop.f32.mrf.mxu3 }
  0xa1   :  { %504 = vmatpush.msra.mxu1 %v77_v5  ;;  %v373_v37 = vpop.f32.mrf.mxu0 }
  0xa2   :  { %653 = vmatmul.msk.f32.vlgmr.msrb.gmra.mxu3 %vm85_vm0, %v373_v37 }
 0x117   :  { %v132_v7 = vpop.f32.mrf.mxu1 }
 0x118   :  { %v141_v8 = vsel %vm140_vm1, %v132_v7, -inf }
 0x119   :  { %v142_v9 = vrot.slane %v141_v8, 4 }
 0x11b   :  { %v143_v10 = vmax.f32 %v141_v8, %v142_v9  ;;  %v270_v9 = vstv %s648_s8 }
 0x11c   :  { %vm271_vm4 = vcmp.lt.s32.totalorder %v830_v17, %v270_v9 }
 0x11d   :  { %v144_v11 = vrot.slane %v143_v10, 2 }
 0x11f   :  { %v145_v12 = vmax.f32 %v143_v10, %v144_v11  ;;  %v649_v11 = vsel %vm271_vm4, 1.0, %v785_v22 }
 0x121   :  { %v146_v13 = vrot.slane %v145_v12, 1 }
 0x123   :  { %v147_v15 = vmax.f32 %v145_v12, %v146_v13 }
 0x125   :  { %v148_v16 = vsub.f32 %v132_v7, %v147_v15  ;;  %v399_v40 = vpop.f32.mrf.mxu3 }
 0x126   :  { %v407_v41 = vsel %vm140_vm1, %v399_v40, -inf }
 0x127   :  { %v149_v18 = vmul.f32 1.442695, %v148_v16  ;;  %v408_v42 = vrot.slane %v407_v41, 4 }
 0x129   :  { %673 = vpow2.f32 %v149_v18  ;;  %v409_v43 = vmax.f32 %v407_v41, %v408_v42  ;;  %v536_v42 = vstv %s660_s11 }
 0x12a   :  { %vm537_vm5 = vcmp.lt.s32.totalorder %v830_v17, %v536_v42 }
 0x12b   :  { %v410_v44 = vrot.slane %v409_v43, 2 }
 0x12d   :  { %v411_v45 = vmax.f32 %v409_v43, %v410_v44  ;;  %v661_v43 = vsel %vm537_vm5, 1.0, %v785_v22 }
 0x12f   :  { %v674_v24 = vpop.eup %673  ;;  %v412_v46 = vrot.slane %v411_v45, 1 }
 0x130   :  { %v151_v25 = vmul.f32 %v674_v24, %v643_v23 }
 0x131   :  { %v413_v47 = vmax.f32 %v411_v45, %v412_v46 }
 0x132   :  { %v152_v26 = vsel %vm140_vm1, %v151_v25, 0.0 }
 0x133   :  { %v153_v27 = vrot.slane %v152_v26, 4  ;;  %v414_v48 = vsub.f32 %v399_v40, %v413_v47 }
 0x135   :  { %v154_v28 = vadd.f32 %v153_v27, %v152_v26  ;;  %v415_v49 = vmul.f32 1.442695, %v414_v48 }
 0x137   :  { %v155_v29 = vrot.slane %v154_v28, 2 }
 0x139   :  { %v156_v30 = vadd.f32 %v155_v29, %v154_v28  ;;  %v483_v28 = vld [vmem:[#allocation2 + $0x3] ss:$4 sm:$0xff] }
 0x13a   :  { %658 = vmatpush.xpose.msk.msra.mxu0 %vm85_vm0, %v483_v28 }
 0x13b   :  { %v157_v31 = vrot.slane %v156_v30, 1 }
 0x13d   :  { %v158_v32 = vadd.f32 %v157_v31, %v156_v30 }
 0x13f   :  { %675 = vrcp.f32 %v158_v32 }
 0x140   :  { %677 = vpow2.f32 %v415_v49 }
 0x145   :  { %v676_v33 = vpop.eup %675 }
 0x146   :  { %v160_v34 = vmul.f32 %v676_v33, %v151_v25  ;;  %v678_v52 = vpop.eup %677  ;;  %v485_v25 = vld [vmem:[#allocation5 + $0x3] ss:$4 sm:$0xff] }
 0x147   :  { %v417_v54 = vmul.f32 %v678_v52, %v655_v53  ;;  %610 = vmatpush.msra.mxu3 %v485_v25 }
 0x148   :  { %161 = vxpose.xlu0.b32.start.end [1/1] (short) (narrow) %v160_v34, 8 }
 0x149   :  { %v418_v55 = vsel %vm140_vm1, %v417_v54, 0.0 }
 0x14a   :  { %v419_v56 = vrot.slane %v418_v55, 4 }
 0x14c   :  { %v420_v58 = vadd.f32 %v419_v56, %v418_v55 }
 0x14e   :  { %v421_v61 = vrot.slane %v420_v58, 2 }
 0x150   :  { %v422_v63 = vadd.f32 %v421_v61, %v420_v58 }
 0x152   :  { %v423_v1 = vrot.slane %v422_v63, 1 }
 0x154   :  { %v424_v3 = vadd.f32 %v423_v1, %v422_v63 }
 0x156   :  { %679 = vrcp.f32 %v424_v3 }
 0x15c   :  { %v680_v7 = vpop.eup %679 }
 0x15d   :  { %v426_v10 = vmul.f32 %v680_v7, %v417_v54 }
 0x15f   :  { %427 = vxpose.xlu1.b32.start.end [1/1] (short) (narrow) %v426_v10, 8 }
 0x1ec   :  { %v177_v38 = vpop.trf.xlu0 }
 0x1ed   :  { %644 = vmatmul.msk.f32.vlgmr.msra.gmra.mxu2 %vm140_vm1, %v177_v38 }
 0x1ee   :  { %477 = vmatpush.msra.mxu2 %v352_v21 }
 0x1f5   :  { %647 = vmatmul.msk.f32.vlgmr.msrb.gmra.mxu2 %vm85_vm0, %v240_v39 }
 0x203   :  { %v443_v26 = vpop.trf.xlu1 }
 0x204   :  { %656 = vmatmul.msk.f32.vlgmr.msra.gmra.mxu2 %vm140_vm1, %v443_v26 }
 0x270   :  { %v843_v50 = vpop.f32.mrf.mxu2 }
 0x278   :  { %v266_v57 = vpop.f32.mrf.mxu2 }
 0x279   :  { %v274_v59 = vsel %vm140_vm1, %v266_v57, -inf }
 0x27a   :  { %v275_v60 = vrot.slane %v274_v59, 4 }
 0x27c   :  { %v276_v62 = vmax.f32 %v274_v59, %v275_v60 }
 0x27e   :  { %v277_v0 = vrot.slane %v276_v62, 2 }
 0x280   :  { %v278_v2 = vmax.f32 %v276_v62, %v277_v0 }
 0x282   :  { %v279_v4 = vrot.slane %v278_v2, 1 }
 0x284   :  { %v280_v5 = vmax.f32 %v278_v2, %v279_v4 }
 0x286   :  { %v281_v6 = vsub.f32 %v266_v57, %v280_v5 }
 0x287   :  { %v479_v30 = vpop.f32.mrf.mxu2 }
 0x288   :  { %v282_v8 = vmul.f32 1.442695, %v281_v6 }
 0x28a   :  { %681 = vpow2.f32 %v282_v8 }
 0x290   :  { %v682_v12 = vpop.eup %681 }
 0x291   :  { %v284_v13 = vmul.f32 %v682_v12, %v649_v11 }
 0x293   :  { %v285_v14 = vsel %vm140_vm1, %v284_v13, 0.0 }
 0x294   :  { %v286_v15 = vrot.slane %v285_v14, 4 }
 0x296   :  { %v287_v16 = vadd.f32 %v286_v15, %v285_v14 }
 0x298   :  { %v288_v18 = vrot.slane %v287_v16, 2 }
 0x29a   :  { %v289_v19 = vadd.f32 %v288_v18, %v287_v16 }
 0x29c   :  { %v290_v20 = vrot.slane %v289_v19, 1 }
 0x29e   :  { %v291_v21 = vadd.f32 %v290_v20, %v289_v19 }
 0x2a0   :  { %683 = vrcp.f32 %v291_v21 }
 0x2a6   :  { %v684_v23 = vpop.eup %683 }
 0x2a7   :  { %v293_v24 = vmul.f32 %v684_v23, %v284_v13 }
 0x2a9   :  { %294 = vxpose.xlu0.b32.start.end [1/1] (short) (narrow) %v293_v24, 8 }
 0x34d   :  { %v310_v27 = vpop.trf.xlu0 }
 0x34e   :  { %650 = vmatmul.msk.f32.vlgmr.msrb.gmra.mxu1 %vm140_vm1, %v310_v27 }
 0x356   :  { %657 = vmatmul.msk.f32.vlgmr.msra.gmra.mxu1 %vm85_vm0, %v485_v25 }
 0x3cb   :  { %v346_v29 = vpop.f32.mrf.mxu1 }
 0x3cc   :  { %616 = vrot.lane.b32.xlu2 %v346_v29, %s786_s9 }
 0x3d3   :  { %v506_v31 = vpop.f32.mrf.mxu1 }
 0x3d4   :  { %620 = vrot.lane.b32.xlu2 %v479_v30, %s787_s10  ;;  %659 = vmatmul.msk.f32.vlgmr.msra.gmra.mxu0 %vm85_vm0, %v506_v31 }
 0x426   :  { %v617_v22 = vpop.permute.xlu2 %616 }
 0x427   :  { %v627_v58 = vsel %vm85_vm0, %v843_v50, %v617_v22 }
 0x42e   :  { %v621_v57 = vpop.permute.xlu2 %620 }
 0x42f   :  { %v629_v59 = vsel %vm628_vm6, %v627_v58, %v621_v57 }
 0x451   :  { %v532_v32 = vpop.f32.mrf.mxu0 }
 0x452   :  { %v540_v33 = vsel %vm140_vm1, %v532_v32, -inf }
 0x453   :  { %v541_v34 = vrot.slane %v540_v33, 4 }
 0x455   :  { %v542_v35 = vmax.f32 %v540_v33, %v541_v34 }
 0x457   :  { %v543_v36 = vrot.slane %v542_v35, 2 }
 0x459   :  { %v544_v37 = vmax.f32 %v542_v35, %v543_v36 }
 0x45b   :  { %v545_v38 = vrot.slane %v544_v37, 1 }
 0x45d   :  { %v546_v39 = vmax.f32 %v544_v37, %v545_v38 }
 0x45f   :  { %v547_v40 = vsub.f32 %v532_v32, %v546_v39 }
 0x461   :  { %v548_v41 = vmul.f32 1.442695, %v547_v40 }
 0x463   :  { %685 = vpow2.f32 %v548_v41 }
 0x469   :  { %v686_v44 = vpop.eup %685 }
 0x46a   :  { %v550_v45 = vmul.f32 %v686_v44, %v661_v43 }
 0x46c   :  { %v551_v46 = vsel %vm140_vm1, %v550_v45, 0.0 }
 0x46d   :  { %v552_v47 = vrot.slane %v551_v46, 4 }
 0x46f   :  { %v553_v48 = vadd.f32 %v552_v47, %v551_v46 }
 0x471   :  { %v554_v49 = vrot.slane %v553_v48, 2 }
 0x473   :  { %v555_v51 = vadd.f32 %v554_v49, %v553_v48 }
 0x475   :  { %v556_v52 = vrot.slane %v555_v51, 1 }
 0x477   :  { %v557_v53 = vadd.f32 %v556_v52, %v555_v51 }
 0x479   :  { %687 = vrcp.f32 %v557_v53 }
 0x47f   :  { %v688_v54 = vpop.eup %687 }
 0x480   :  { %v559_v55 = vmul.f32 %v688_v54, %v550_v45 }
 0x482   :  { %560 = vxpose.xlu1.b32.start.end [1/1] (short) (narrow) %v559_v55, 8 }
 0x526   :  { %v576_v56 = vpop.trf.xlu1 }
 0x527   :  { %662 = vmatmul.msk.f32.vlgmr.msra.gmra.mxu3 %vm140_vm1, %v576_v56 }
 0x5aa   :  { %v612_v17 = vpop.f32.mrf.mxu3 }
 0x5ab   :  { %624 = vrot.lane.b32.xlu0 %v612_v17, %s788_s12 }
 0x61d   :  { %v625_v60 = vpop.permute.xlu0 %624 }
 0x61e   :  { %v631_v61 = vsel %vm630_vm7, %v629_v59, %v625_v60 }
 0x61f   :  { %632 = vst [vmem:[%s871_s4] sm:$0xff] %v631_v61 }
 0x620   :  { %637 = vsyncpa [#allocation3], 1 }
 0x621   :  { %638 = vsyncpa [#allocation6], 1 }
 0x622   :  { %639 = vsyncpa [#allocation4], 1 }

</bundles_post_ra>
